<compile_context>
chip_gen: v6e
topology: v6e:2x2x1
jax: 0.10.0
libtpu: 0.0.40
codegen_flags: <defaults>
</compile_context>

<pallas_src>
import jax
import jax.numpy as jnp
from jax.experimental import pallas as pl
from jax.experimental.pallas import tpu as pltpu


_LANE = 128
_SUBLANE = 8
_VMEM_BUDGET = 40 * 1024 * 1024     # double-buffered tile footprint budget
_VMEM_LIMIT = 48 * 1024 * 1024      # scoped limit; <= v7x 64 MiB physical


def _round_up(x, m):
    return ((x + m - 1) // m) * m


def _make_clip_score_kernel(n_text):
    """n_text: real (unpadded) number of text prompts, for softmax masking."""

    def kernel(x_ref, w_ref, t_ref, out_ref, acc_ref):
        # x_ref  : [TM, TK]  bf16  flattened-pixel tile
        # w_ref  : [TK, Dp]  bf16  image-encoder projection tile
        # t_ref  : [Dp, Tp]  bf16  pre-normalized text features (transposed)
        # out_ref: [TM, Tp]  f32   softmax scores
        # acc_ref: [TM, Dp]  f32   projection accumulator (VMEM scratch)
        k = pl.program_id(1)

        @pl.when(k == 0)
        def _init():
            acc_ref[...] = jnp.zeros_like(acc_ref)

        # encode_image stand-in: streamed bf16 matmul, f32 accumulation (MXU).
        acc_ref[...] += jnp.dot(
            x_ref[...], w_ref[...], preferred_element_type=jnp.float32)

        @pl.when(k == pl.num_programs(1) - 1)
        def _finalize():
            img = acc_ref[...]
            # 1/||image_features|| (eps=1e-12 inside the squared norm; the
            # reference divides by the plain norm -- difference is negligible).
            inv = jax.lax.rsqrt(
                jnp.sum(img * img, axis=-1, keepdims=True) + 1e-12)
            # logits = (img @ text.T) * inv  -- the row scale distributes over
            # the contraction, so normalize AFTER the matmul ([TM,Tp] scale
            # instead of a [TM,Dp] one).  bf16 x bf16 -> f32 keeps the MXU in
            # single-pass mode.
            logits = jnp.dot(img.astype(jnp.bfloat16), t_ref[...],
                             preferred_element_type=jnp.float32) * inv
            # Mask padded text columns so they vanish from the softmax.
            col = jax.lax.broadcasted_iota(jnp.int32, logits.shape, 1)
            logits = jnp.where(col < n_text, logits, jnp.float32(-jnp.inf))
            m = jnp.max(logits, axis=-1, keepdims=True)
            e = jnp.exp(logits - m)
            denom = jnp.sum(e, axis=-1, keepdims=True)
            out_ref[...] = (e / denom).astype(out_ref.dtype)  # exact softmax

    return kernel


def prepare_clip_super_params(w_img, text_features, *, tile_m=512, tile_k=2048):
    """One-time prep mirroring clip.load + equip_semantic_modal.

    Pads / casts the image-encoder projection to a bf16 [Fp, Dp] slab and the
    L2-normalized text features to a bf16 [Dp, Tp] slab so the per-call
    forward never re-pads or re-casts full-size weights (for real CLIP shapes
    that is a ~150-300 MB HBM round trip per call).  Also picks tile sizes
    under a VMEM budget that is safe for v5e/v6e/v7x.
    """
    F, D = w_img.shape
    T, Dt = text_features.shape
    assert Dt == D

    Dp = _round_up(D, _LANE)            # lane-dense feature dim
    Tp = _round_up(T, _LANE)            # lane-dense score dim

    def footprint(tm, tk):
        return (2 * tm * tk * 2         # x   bf16, double-buffered
                + 2 * tk * Dp * 2       # w   bf16, double-buffered
                + 2 * Dp * Tp * 2       # txt bf16 (worst case 2 buffers)
                + 2 * tm * Tp * 4       # out f32
                + tm * Dp * 4)          # acc scratch f32

    TM = max(_SUBLANE, (min(tile_m, 1024) // _SUBLANE) * _SUBLANE)
    TK = min(tile_k, _round_up(F, _LANE))
    TK = max(_LANE, (TK // _LANE) * _LANE)
    while footprint(TM, TK) > _VMEM_BUDGET and TK > _LANE:
        TK = max(_LANE, ((TK // 2) // _LANE) * _LANE)
    while footprint(TM, TK) > _VMEM_BUDGET and TM > _SUBLANE:
        TM = max(_SUBLANE, TM // 2)

    Fp = _round_up(F, TK)

    w = jnp.pad(w_img.astype(jnp.bfloat16), ((0, Fp - F), (0, Dp - D)))

    txt = text_features.astype(jnp.float32)
    txt = txt / jnp.linalg.norm(txt, axis=-1, keepdims=True)
    t_dt = jnp.pad(txt.T, ((0, Dp - D), (0, Tp - T))).astype(jnp.bfloat16)

    return dict(w=w, t=t_dt, F=F, D=D, T=T,
                Fp=Fp, Dp=Dp, Tp=Tp, tile_m=TM, tile_k=TK)


def clip_model_super_forward(vision_inputs, params):
    """vision_inputs [B,C,H,W] NCHW; params from prepare_clip_super_params.

    Returns softmax scores [B, T] float32 (CLIPModel_Super.forward).
    """
    B = vision_inputs.shape[0]
    F, T = params["F"], params["T"]
    Fp, Dp, Tp = params["Fp"], params["Dp"], params["Tp"]
    TK = params["tile_k"]
    # Maximize the batch tile (fewest re-streams of the [Fp,Dp] weight slab);
    # this kernel is weight-bandwidth bound.
    TM = min(params["tile_m"], _round_up(B, _SUBLANE))
    Bp = _round_up(B, TM)

    x = jnp.pad(vision_inputs.reshape(B, -1).astype(jnp.bfloat16),
                ((0, Bp - B), (0, Fp - F)))

    grid = (Bp // TM, Fp // TK)

    cost = pl.CostEstimate(
        flops=2 * Bp * Fp * Dp + 2 * Bp * Dp * Tp,
        transcendentals=Bp * Tp + Bp,
        bytes_accessed=(Bp * Fp * 2                  # x (bf16)
                        + (Bp // TM) * Fp * Dp * 2   # w re-streamed per M tile
                        + Dp * Tp * 2                # text features (bf16)
                        + Bp * Tp * 4),              # scores
    )

    def build(single_buffer_text):
        text_kwargs = (dict(pipeline_mode=pl.Buffered(1))
                       if single_buffer_text else {})
        return pl.pallas_call(
            _make_clip_score_kernel(T),
            out_shape=jax.ShapeDtypeStruct((Bp, Tp), jnp.float32),
            grid_spec=pltpu.PrefetchScalarGridSpec(
                num_scalar_prefetch=0,
                grid=grid,
                in_specs=[
                    pl.BlockSpec((TM, TK), lambda i, k: (i, k)),   # x  (bf16)
                    pl.BlockSpec((TK, Dp), lambda i, k: (k, 0)),   # w  (bf16)
                    pl.BlockSpec((Dp, Tp), lambda i, k: (0, 0),    # txt(bf16)
                                 **text_kwargs),
                ],
                out_specs=pl.BlockSpec((TM, Tp), lambda i, k: (i, 0)),
                scratch_shapes=[pltpu.VMEM((TM, Dp), jnp.float32)],
            ),
            compiler_params=pltpu.CompilerParams(
                dimension_semantics=("parallel", "arbitrary"),
                vmem_limit_bytes=_VMEM_LIMIT,
            ),
            cost_estimate=cost,
        )

    try:
        # Constant-index text slab never needs a second buffer.
        scores_padded = build(True)(x, params["w"], params["t"])
    except Exception:
        # pipeline_mode/Buffered not supported on this jax build -> default.
        scores_padded = build(False)(x, params["w"], params["t"])

    return scores_padded[:B, :T]


def _reference(vision_inputs, w_img, text_features):
    B = vision_inputs.shape[0]
    x = vision_inputs.reshape(B, -1).astype(jnp.float32)
    img = x @ w_img.astype(jnp.float32)
    img = img / jnp.linalg.norm(img, axis=-1, keepdims=True)
    txt = text_features.astype(jnp.float32)
    txt = txt / jnp.linalg.norm(txt, axis=-1, keepdims=True)
    logits = img @ txt.T
    return jax.nn.softmax(logits, axis=-1)


if __name__ == "__main__":
    B, C, H, W = 2, 4, 16, 16          # vision inputs (NCHW)
    D = 32                             # CLIP embedding dim (small synthetic)
    T = 8                              # number of text prompts ("classes")

    key = jax.random.PRNGKey(0)
    k_x, k_w, k_t = jax.random.split(key, 3)

    vision_inputs = jax.random.normal(k_x, (B, C, H, W), dtype=jnp.float32)
    # Deterministic synthetic parameters (stand-in for CLIP weights / text).
    w_img = jax.random.normal(k_w, (C * H * W, D), dtype=jnp.float32) * 0.02
    text_features = jax.random.normal(k_t, (T, D), dtype=jnp.float32)

    # One-time prep (clip.load + equip_semantic_modal analogue); the padded
    # bf16 weight / text slabs are reused across subsequent forward calls.
    params = prepare_clip_super_params(w_img, text_features)

    scores = clip_model_super_forward(vision_inputs, params)
    scores = jax.block_until_ready(scores)

    ref = _reference(vision_inputs, w_img, text_features)
    assert scores.shape == (B, T) and scores.dtype == jnp.float32
    # Exact softmax divide -> rows sum to 1 within f32 rounding.
    assert jnp.allclose(jnp.sum(scores, axis=-1), 1.0, atol=1e-4)
    # bf16 matmul operands (projection, text, logits) -> loosened tolerance.
    assert jnp.allclose(scores, ref, atol=5e-3, rtol=5e-2)

    print("KERNEL_OK")
</pallas_src>

<mosaic_0001>
module attributes {stable_mosaic.version = 11 : i64} {
  func.func @kernel(%arg0: i32, %arg1: i32, %arg2: memref<8x1024xbf16, #tpu.memory_space<vmem>>, %arg3: memref<1024x128xbf16, #tpu.memory_space<vmem>>, %arg4: memref<128x128xbf16, #tpu.memory_space<vmem>>, %arg5: memref<8x128xf32, #tpu.memory_space<vmem>>, %arg6: memref<8x128xf32, #tpu.memory_space<vmem>>) attributes {dimension_semantics = [#tpu.dimension_semantics<parallel>, #tpu.dimension_semantics<arbitrary>], iteration_bounds = array<i64: 1, 1>, scalar_prefetch = 0 : i64, scratch_operands = 1 : i64, tpu.core_type = #tpu.core_type<tc>, window_params = [{transform_indices = @transform_0, window_bounds = array<i64: 8, 1024>}, {transform_indices = @transform_1, window_bounds = array<i64: 1024, 128>}, {pipeline_mode = #tpu.pipeline_mode<synchronous>, transform_indices = @transform_2, window_bounds = array<i64: 128, 128>}, {transform_indices = @transform_3, window_bounds = array<i64: 8, 128>}]} {
    %c0_i32 = arith.constant 0 : i32
    %0 = arith.cmpi eq, %arg1, %c0_i32 : i32
    %1 = arith.extui %0 : i1 to i32
    %c0_i32_0 = arith.constant 0 : i32
    %2 = arith.cmpi ne, %1, %c0_i32_0 : i32
    scf.if %2 {
      %cst_10 = arith.constant 0.000000e+00 : f32
      %12 = vector.broadcast %cst_10 : f32 to vector<8x128xf32>
      %c0_11 = arith.constant 0 : index
      %c0_12 = arith.constant 0 : index
      %13 = vector.load %arg6[%c0_11, %c0_12] : memref<8x128xf32, #tpu.memory_space<vmem>>, vector<8x128xf32>
      tpu.vector_store %arg6[%c0_11, %c0_12], %12 {strides = array<i32>} : memref<8x128xf32, #tpu.memory_space<vmem>>, vector<8x128xf32>,
    } else {
    }
    %c0 = arith.constant 0 : index
    %c0_1 = arith.constant 0 : index
    %3 = vector.load %arg6[%c0, %c0_1] : memref<8x128xf32, #tpu.memory_space<vmem>>, vector<8x128xf32>
    %c0_2 = arith.constant 0 : index
    %c0_3 = arith.constant 0 : index
    %4 = vector.load %arg2[%c0_2, %c0_3] : memref<8x1024xbf16, #tpu.memory_space<vmem>>, vector<8x1024xbf16>
    %c0_4 = arith.constant 0 : index
    %c0_5 = arith.constant 0 : index
    %5 = vector.load %arg3[%c0_4, %c0_5] : memref<1024x128xbf16, #tpu.memory_space<vmem>>, vector<1024x128xbf16>
    %cst = arith.constant dense<0.000000e+00> : vector<8x128xf32>
    %6 = tpu.matmul %4, %5, %cst {dimension_numbers = #tpu.dot_dimension_numbers<[1], [0], [0], [1], [0, 0, 1, 1], [], []>} : vector<8x1024xbf16>, vector<1024x128xbf16>, vector<8x128xf32> -> vector<8x128xf32>
    %7 = arith.addf %3, %6 : vector<8x128xf32>
    %c0_6 = arith.constant 0 : index
    %c0_7 = arith.constant 0 : index
    %8 = vector.load %arg6[%c0_6, %c0_7] : memref<8x128xf32, #tpu.memory_space<vmem>>, vector<8x128xf32>
    tpu.vector_store %arg6[%c0_6, %c0_7], %7 {strides = array<i32>} : memref<8x128xf32, #tpu.memory_space<vmem>>, vector<8x128xf32>,
    %c0_i32_8 = arith.constant 0 : i32
    %9 = arith.cmpi eq, %arg1, %c0_i32_8 : i32
    %10 = arith.extui %9 : i1 to i32
    %c0_i32_9 = arith.constant 0 : i32
    %11 = arith.cmpi ne, %10, %c0_i32_9 : i32
    scf.if %11 {
      %c0_10 = arith.constant 0 : index
      %c0_11 = arith.constant 0 : index
      %12 = vector.load %arg6[%c0_10, %c0_11] : memref<8x128xf32, #tpu.memory_space<vmem>>, vector<8x128xf32>
      %13 = arith.mulf %12, %12 : vector<8x128xf32>
      %cst_12 = arith.constant dense<0.000000e+00> : vector<8xf32>
      %14 = vector.multi_reduction <add>, %13, %cst_12 [1] : vector<8x128xf32> to vector<8xf32>
      %15 = vector.shape_cast %14 : vector<8xf32> to vector<8x1xf32>
      %cst_13 = arith.constant 9.99999996E-13 : f32
      %16 = vector.broadcast %cst_13 : f32 to vector<8x1xf32>
      %17 = arith.addf %15, %16 : vector<8x1xf32>
      %18 = math.rsqrt %17 : vector<8x1xf32>
      %19 = arith.truncf %12 : vector<8x128xf32> to vector<8x128xbf16>
      %c0_14 = arith.constant 0 : index
      %c0_15 = arith.constant 0 : index
      %20 = vector.load %arg4[%c0_14, %c0_15] : memref<128x128xbf16, #tpu.memory_space<vmem>>, vector<128x128xbf16>
      %cst_16 = arith.constant dense<0.000000e+00> : vector<8x128xf32>
      %21 = tpu.matmul %19, %20, %cst_16 {dimension_numbers = #tpu.dot_dimension_numbers<[1], [0], [0], [1], [0, 0, 1, 1], [], []>} : vector<8x128xbf16>, vector<128x128xbf16>, vector<8x128xf32> -> vector<8x128xf32>
      %22 = vector.broadcast %18 : vector<8x1xf32> to vector<8x128xf32>
      %23 = arith.mulf %21, %22 : vector<8x128xf32>
      %24 = tpu.iota {dimensions = array<i32: 1>} : vector<8x128xi32>
      %c8_i32 = arith.constant 8 : i32
      %25 = vector.broadcast %c8_i32 : i32 to vector<8x128xi32>
      %26 = arith.cmpi slt, %24, %25 : vector<8x128xi32>
      %cst_17 = arith.constant 0xFF800000 : f32
      %27 = vector.broadcast %cst_17 : f32 to vector<8x128xf32>
      %28 = arith.select %26, %23, %27 : vector<8x128xi1>, vector<8x128xf32>
      %cst_18 = arith.constant dense<0xFF800000> : vector<8xf32>
      %29 = vector.multi_reduction <maximumf>, %28, %cst_18 [1] : vector<8x128xf32> to vector<8xf32>
      %30 = vector.shape_cast %29 : vector<8xf32> to vector<8x1xf32>
      %31 = vector.broadcast %30 : vector<8x1xf32> to vector<8x128xf32>
      %32 = arith.subf %28, %31 : vector<8x128xf32>
      %33 = math.exp %32 : vector<8x128xf32>
      %cst_19 = arith.constant dense<0.000000e+00> : vector<8xf32>
      %34 = vector.multi_reduction <add>, %33, %cst_19 [1] : vector<8x128xf32> to vector<8xf32>
      %35 = vector.shape_cast %34 : vector<8xf32> to vector<8x1xf32>
      %36 = vector.broadcast %35 : vector<8x1xf32> to vector<8x128xf32>
      %37 = arith.divf %33, %36 : vector<8x128xf32>
      %c0_20 = arith.constant 0 : index
      %c0_21 = arith.constant 0 : index
      %38 = vector.load %arg5[%c0_20, %c0_21] : memref<8x128xf32, #tpu.memory_space<vmem>>, vector<8x128xf32>
      tpu.vector_store %arg5[%c0_20, %c0_21], %37 {strides = array<i32>} : memref<8x128xf32, #tpu.memory_space<vmem>>, vector<8x128xf32>,
    } else {
    }
    return
  }
  func.func @transform_0(%arg0: i32, %arg1: i32) -> (i32, i32) {
    %c0_i32 = arith.constant 0 : i32
    return %arg0, %arg1 : i32, i32
  }
  func.func @transform_1(%arg0: i32, %arg1: i32) -> (i32, i32) {
    %c0_i32 = arith.constant 0 : i32
    %c0_i32_0 = arith.constant 0 : i32
    return %arg1, %c0_i32 : i32, i32
  }
  func.func @transform_2(%arg0: i32, %arg1: i32) -> (i32, i32) {
    %c0_i32 = arith.constant 0 : i32
    %c0_i32_0 = arith.constant 0 : i32
    %c0_i32_1 = arith.constant 0 : i32
    return %c0_i32, %c0_i32_0 : i32, i32
  }
  func.func @transform_3(%arg0: i32, %arg1: i32) -> (i32, i32) {
    %c0_i32 = arith.constant 0 : i32
    %c0_i32_0 = arith.constant 0 : i32
    return %arg0, %c0_i32 : i32, i32
  }
}

module attributes {stable_mosaic.version = 11 : i64} {
  func.func @kernel(%arg0: i32, %arg1: i32, %arg2: memref<8x1024xbf16, #tpu.memory_space<vmem>>, %arg3: memref<1024x128xbf16, #tpu.memory_space<vmem>>, %arg4: memref<128x128xbf16, #tpu.memory_space<vmem>>, %arg5: memref<8x128xf32, #tpu.memory_space<vmem>>, %arg6: memref<8x128xf32, #tpu.memory_space<vmem>>) attributes {dimension_semantics = [#tpu.dimension_semantics<parallel>, #tpu.dimension_semantics<arbitrary>], iteration_bounds = array<i64: 1, 1>, scalar_prefetch = 0 : i64, scratch_operands = 1 : i64, tpu.core_type = #tpu.core_type<tc>, window_params = [{transform_indices = @transform_0, window_bounds = array<i64: 8, 1024>}, {transform_indices = @transform_1, window_bounds = array<i64: 1024, 128>}, {pipeline_mode = #tpu.pipeline_mode<synchronous>, transform_indices = @transform_2, window_bounds = array<i64: 128, 128>}, {transform_indices = @transform_3, window_bounds = array<i64: 8, 128>}]} {
    %c0_i32 = arith.constant 0 : i32
    %0 = arith.cmpi eq, %arg1, %c0_i32 : i32
    %1 = arith.extui %0 : i1 to i32
    %c0_i32_0 = arith.constant 0 : i32
    %2 = arith.cmpi ne, %1, %c0_i32_0 : i32
    scf.if %2 {
      %cst_10 = arith.constant 0.000000e+00 : f32
      %12 = vector.broadcast %cst_10 : f32 to vector<8x128xf32>
      %c0_11 = arith.constant 0 : index
      %c0_12 = arith.constant 0 : index
      %13 = vector.load %arg6[%c0_11, %c0_12] : memref<8x128xf32, #tpu.memory_space<vmem>>, vector<8x128xf32>
      tpu.vector_store %arg6[%c0_11, %c0_12], %12 {strides = array<i32>} : memref<8x128xf32, #tpu.memory_space<vmem>>, vector<8x128xf32>,
    } else {
    }
    %c0 = arith.constant 0 : index
    %c0_1 = arith.constant 0 : index
    %3 = vector.load %arg6[%c0, %c0_1] : memref<8x128xf32, #tpu.memory_space<vmem>>, vector<8x128xf32>
    %c0_2 = arith.constant 0 : index
    %c0_3 = arith.constant 0 : index
    %4 = vector.load %arg2[%c0_2, %c0_3] : memref<8x1024xbf16, #tpu.memory_space<vmem>>, vector<8x1024xbf16>
    %c0_4 = arith.constant 0 : index
    %c0_5 = arith.constant 0 : index
    %5 = vector.load %arg3[%c0_4, %c0_5] : memref<1024x128xbf16, #tpu.memory_space<vmem>>, vector<1024x128xbf16>
    %cst = arith.constant dense<0.000000e+00> : vector<8x128xf32>
    %6 = tpu.matmul %4, %5, %cst {dimension_numbers = #tpu.dot_dimension_numbers<[1], [0], [0], [1], [0, 0, 1, 1], [], []>} : vector<8x1024xbf16>, vector<1024x128xbf16>, vector<8x128xf32> -> vector<8x128xf32>
    %7 = arith.addf %3, %6 : vector<8x128xf32>
    %c0_6 = arith.constant 0 : index
    %c0_7 = arith.constant 0 : index
    %8 = vector.load %arg6[%c0_6, %c0_7] : memref<8x128xf32, #tpu.memory_space<vmem>>, vector<8x128xf32>
    tpu.vector_store %arg6[%c0_6, %c0_7], %7 {strides = array<i32>} : memref<8x128xf32, #tpu.memory_space<vmem>>, vector<8x128xf32>,
    %c0_i32_8 = arith.constant 0 : i32
    %9 = arith.cmpi eq, %arg1, %c0_i32_8 : i32
    %10 = arith.extui %9 : i1 to i32
    %c0_i32_9 = arith.constant 0 : i32
    %11 = arith.cmpi ne, %10, %c0_i32_9 : i32
    scf.if %11 {
      %c0_10 = arith.constant 0 : index
      %c0_11 = arith.constant 0 : index
      %12 = vector.load %arg6[%c0_10, %c0_11] : memref<8x128xf32, #tpu.memory_space<vmem>>, vector<8x128xf32>
      %13 = arith.mulf %12, %12 : vector<8x128xf32>
      %cst_12 = arith.constant dense<0.000000e+00> : vector<8xf32>
      %14 = vector.multi_reduction <add>, %13, %cst_12 [1] : vector<8x128xf32> to vector<8xf32>
      %15 = vector.shape_cast %14 : vector<8xf32> to vector<8x1xf32>
      %cst_13 = arith.constant 9.99999996E-13 : f32
      %16 = vector.broadcast %cst_13 : f32 to vector<8x1xf32>
      %17 = arith.addf %15, %16 : vector<8x1xf32>
      %18 = math.rsqrt %17 : vector<8x1xf32>
      %19 = arith.truncf %12 : vector<8x128xf32> to vector<8x128xbf16>
      %c0_14 = arith.constant 0 : index
      %c0_15 = arith.constant 0 : index
      %20 = vector.load %arg4[%c0_14, %c0_15] : memref<128x128xbf16, #tpu.memory_space<vmem>>, vector<128x128xbf16>
      %cst_16 = arith.constant dense<0.000000e+00> : vector<8x128xf32>
      %21 = tpu.matmul %19, %20, %cst_16 {dimension_numbers = #tpu.dot_dimension_numbers<[1], [0], [0], [1], [0, 0, 1, 1], [], []>} : vector<8x128xbf16>, vector<128x128xbf16>, vector<8x128xf32> -> vector<8x128xf32>
      %22 = vector.broadcast %18 : vector<8x1xf32> to vector<8x128xf32>
      %23 = arith.mulf %21, %22 : vector<8x128xf32>
      %24 = tpu.iota {dimensions = array<i32: 1>} : vector<8x128xi32>
      %c8_i32 = arith.constant 8 : i32
      %25 = vector.broadcast %c8_i32 : i32 to vector<8x128xi32>
      %26 = arith.cmpi slt, %24, %25 : vector<8x128xi32>
      %cst_17 = arith.constant 0xFF800000 : f32
      %27 = vector.broadcast %cst_17 : f32 to vector<8x128xf32>
      %28 = arith.select %26, %23, %27 : vector<8x128xi1>, vector<8x128xf32>
      %cst_18 = arith.constant dense<0xFF800000> : vector<8xf32>
      %29 = vector.multi_reduction <maximumf>, %28, %cst_18 [1] : vector<8x128xf32> to vector<8xf32>
      %30 = vector.shape_cast %29 : vector<8xf32> to vector<8x1xf32>
      %31 = vector.broadcast %30 : vector<8x1xf32> to vector<8x128xf32>
      %32 = arith.subf %28, %31 : vector<8x128xf32>
      %33 = math.exp %32 : vector<8x128xf32>
      %cst_19 = arith.constant dense<0.000000e+00> : vector<8xf32>
      %34 = vector.multi_reduction <add>, %33, %cst_19 [1] : vector<8x128xf32> to vector<8xf32>
      %35 = vector.shape_cast %34 : vector<8xf32> to vector<8x1xf32>
      %36 = vector.broadcast %35 : vector<8x1xf32> to vector<8x128xf32>
      %37 = arith.divf %33, %36 : vector<8x128xf32>
      %c0_20 = arith.constant 0 : index
      %c0_21 = arith.constant 0 : index
      %38 = vector.load %arg5[%c0_20, %c0_21] : memref<8x128xf32, #tpu.memory_space<vmem>>, vector<8x128xf32>
      tpu.vector_store %arg5[%c0_20, %c0_21], %37 {strides = array<i32>} : memref<8x128xf32, #tpu.memory_space<vmem>>, vector<8x128xf32>,
    } else {
    }
    return
  }
  func.func @transform_0(%arg0: i32, %arg1: i32) -> (i32, i32) {
    %c0_i32 = arith.constant 0 : i32
    return %arg0, %arg1 : i32, i32
  }
  func.func @transform_1(%arg0: i32, %arg1: i32) -> (i32, i32) {
    %c0_i32 = arith.constant 0 : i32
    %c0_i32_0 = arith.constant 0 : i32
    return %arg1, %c0_i32 : i32, i32
  }
  func.func @transform_2(%arg0: i32, %arg1: i32) -> (i32, i32) {
    %c0_i32 = arith.constant 0 : i32
    %c0_i32_0 = arith.constant 0 : i32
    %c0_i32_1 = arith.constant 0 : i32
    return %c0_i32, %c0_i32_0 : i32, i32
  }
  func.func @transform_3(%arg0: i32, %arg1: i32) -> (i32, i32) {
    %c0_i32 = arith.constant 0 : i32
    %c0_i32_0 = arith.constant 0 : i32
    return %arg0, %c0_i32 : i32, i32
  }
}

</mosaic_0001>

<bundles_post_ra>
// kernel: tpu_custom_call.1
= control target key start
LH: loop header
LB: loop body
LE: loop exit
PB: predicated region body
PF: predicated region fallthrough
CT: control target
= control target key end

     0   :  { %8 = vsyncpa [#allocation4], 0  ;;  %s1329_s0 = inlined_call_operand.hbm [shape: bf16[8,1024], index: 0, kind: input, shape index: {}]   ;;  %s1330_s1 = inlined_call_operand.hbm [shape: bf16[1024,128], index: 1, kind: input, shape index: {}]   ;;  %s1331_s2 = inlined_call_operand.hbm [shape: bf16[128,128], index: 2, kind: input, shape index: {}]   ;;  %s1332_s3 = inlined_call_operand.hbm [shape: f32[8,128], index: 3, kind: output, shape index: {}]  }
   0x1   :  { %9 = vsyncpa [#allocation7], 0 }
   0x2   :  { %10 = vsyncpa [#allocation5], 0  ;;  %s1289_s12 = smov [#allocation6]  }
   0x3   :  { %s26_s13 = sshll.u32 %s1289_s12, 4  ;;  %s27_s13 = int_to_ptr.vmem [resolvable:$true] %s26_s13 }
   0x4   :  { %s1211_s14 = scalar_lea.vmem %s27_s13, 8192  ;;  %p1216_p1 = scmp.lt.s32.totalorder %s27_s13, %s27_s13 }
   0x5   :  { %p1212_p0 = scmp.ne.s32.totalorder %s27_s13, %s1211_s14  ;;  %p1217_p2 = scmp.lt.s32.totalorder %s1211_s14, %s1211_s14 }
   0x7   :  { %p1218_p3 = por %p1217_p2, %p1216_p1 }
   0x9   :  { %p1219_p4 = pnand %p1218_p3, %p1212_p0 }
   0xb   :  { %1222 = shalt.err (!%p1219_p4)
}
   0xc   :  { %s1290_s15 = smov 64   ;;  %s1291_s16 = smov 4  }
   0xd   :  { %32 = dma.hbm_to_vmem [thread:$0]  %s1330_s1, 8192, %s27_s13, [#allocation7], %s1290_s15, %s1290_s15, %s1291_s16  }
   0xe   :  { %s1292_s19 = smov [#allocation3]   ;;  %s1293_s21 = smov [#allocation8]  }
   0xf   :  { %s17_s20 = sshll.u32 %s1292_s19, 4  ;;  %s38_s22 = sshll.u32 %s1293_s21, 4  ;;  %s18_s20 = int_to_ptr.vmem [resolvable:$true] %s17_s20  ;;  %s39_s22 = int_to_ptr.vmem [resolvable:$true] %s38_s22 }
  0x10   :  { %s1231_s23 = scalar_lea.vmem %s18_s20, 512  ;;  %p1236_p6 = scmp.lt.s32.totalorder %s18_s20, %s18_s20 }
  0x11   :  { %p1232_p5 = scmp.ne.s32.totalorder %s18_s20, %s1231_s23  ;;  %p1237_p7 = scmp.lt.s32.totalorder %s1231_s23, %s1231_s23 }
  0x13   :  { %p1238_p8 = por %p1237_p7, %p1236_p6 }
  0x15   :  { %p1239_p9 = pnand %p1238_p8, %p1232_p5 }
  0x17   :  { %1242 = shalt.err (!%p1239_p9)
}
  0x18   :  { %20 = dma.hbm_to_vmem [thread:$0]  %s1329_s0, 512, %s18_s20, [#allocation4]  }
  0x19   :  { %s1251_s26 = scalar_lea.vmem %s39_s22, 1024  ;;  %p1256_p11 = scmp.lt.s32.totalorder %s39_s22, %s39_s22 }
  0x1a   :  { %p1252_p10 = scmp.ne.s32.totalorder %s39_s22, %s1251_s26  ;;  %p1257_p12 = scmp.lt.s32.totalorder %s1251_s26, %s1251_s26 }
  0x1c   :  { %p1258_p13 = por %p1257_p12, %p1256_p11 }
  0x1e   :  { %p1259_p0 = pnand %p1258_p13, %p1252_p10 }
  0x20   :  { %1262 = shalt.err (!%p1259_p0)
}
  0x21   :  { %44 = dma.hbm_to_vmem [thread:$0]  %s1331_s2, 1024, %s39_s22, [#allocation7], %s1290_s15, %s1290_s15, %s1291_s16  }
  0x22   :  { %1283 = dma.done.wait [#allocation4], 512  }
  0x23   :  { %1284 = vsyncadd [#allocation4], 4294966784 }
  0x24   :  { %1285 = dma.done.wait [#allocation7], 9216  }
  0x25   :  { %1286 = vsyncadd [#allocation7], 4294958080  ;;  %v1117_v0 = vld [vmem:[#allocation6 + $0x78] sm:$0xff]   ;;  %v1121_v4 = vld [vmem:[#allocation6 + $0x70] sm:$0xff]   ;;  %vm1295_vm0 = vmmov 0   ;;  %s1296_s0 = smov [#allocation9]  }
  0x26   :  { %v1118_v1 = vld [vmem:[#allocation6 + $0xf8] sm:$0xff]   ;;  %992 = vmatprep.subr.bf16.mxu0 %v1117_v0  ;;  %v1122_v5 = vld [vmem:[#allocation6 + $0xf0] sm:$0xff]   ;;  %v1125_v8 = vld [vmem:[#allocation6 + $0x68] sm:$0xff]   ;;  %s902_s2 = sshll.u32 %s1296_s0, 4  ;;  %s903_s2 = int_to_ptr.vmem [resolvable:$true] %s902_s2 }
  0x27   :  { %v1119_v2 = vld [vmem:[#allocation6 + $0x38] sm:$0xff]   ;;  %1014 = vmatprep.subr.bf16.mxu1 %v1118_v1  ;;  %v1123_v6 = vld [vmem:[#allocation6 + $0x30] sm:$0xff]   ;;  %v1126_v9 = vld [vmem:[#allocation6 + $0xe8] sm:$0xff]   ;;  %s1263_s28 = scalar_lea.vmem %s903_s2, 128  ;;  %p1268_p2 = scmp.lt.s32.totalorder %s903_s2, %s903_s2 }
  0x28   :  { %v1120_v3 = vld [vmem:[#allocation6 + $0xb8] sm:$0xff]   ;;  %993 = vmatpush3.bf16.msra.mxu0 %v1119_v2  ;;  %v1124_v7 = vld [vmem:[#allocation6 + $0xb0] sm:$0xff]   ;;  %v1127_v10 = vld [vmem:[#allocation6 + $0x28] sm:$0xff]   ;;  %p1264_p1 = scmp.ne.s32.totalorder %s903_s2, %s1263_s28  ;;  %p1269_p3 = scmp.lt.s32.totalorder %s1263_s28, %s1263_s28 }
  0x29   :  { %1015 = vmatpush3.bf16.msra.mxu1 %v1120_v3  ;;  %994 = vmatprep.subr.bf16.mxu0 %v1121_v4  ;;  %v1128_v11 = vld [vmem:[#allocation6 + $0xa8] sm:$0xff]   ;;  %v1129_v12 = vld [vmem:[#allocation6 + $0x60] sm:$0xff]   ;;  %v1133_v16 = vld [vmem:[#allocation6 + $0x58] sm:$0xff]  }
  0x2a   :  { %1016 = vmatprep.subr.bf16.mxu1 %v1122_v5  ;;  %v1130_v13 = vld [vmem:[#allocation6 + $0xe0] sm:$0xff]   ;;  %v1134_v17 = vld [vmem:[#allocation6 + $0xd8] sm:$0xff]   ;;  %v1137_v20 = vld [vmem:[#allocation6 + $0x50] sm:$0xff]   ;;  %p1270_p4 = por %p1269_p3, %p1268_p2 }
  0x2b   :  { %v1131_v14 = vld [vmem:[#allocation6 + $0x20] sm:$0xff]   ;;  %v1135_v18 = vld [vmem:[#allocation6 + $0x18] sm:$0xff]   ;;  %v1138_v21 = vld [vmem:[#allocation6 + $0xd0] sm:$0xff]  }
  0x2c   :  { %995 = vmatpush3.bf16.msra.mxu0 %v1123_v6  ;;  %v1132_v15 = vld [vmem:[#allocation6 + $0xa0] sm:$0xff]   ;;  %v1136_v19 = vld [vmem:[#allocation6 + $0x98] sm:$0xff]   ;;  %v1139_v22 = vld [vmem:[#allocation6 + $0x10] sm:$0xff]   ;;  %p1271_p5 = pnand %p1270_p4, %p1264_p1 }
  0x2d   :  { %1017 = vmatpush3.bf16.msra.mxu1 %v1124_v7  ;;  %996 = vmatprep.subr.bf16.mxu0 %v1125_v8  ;;  %v1140_v23 = vld [vmem:[#allocation6 + $0x90] sm:$0xff]   ;;  %v1141_v24 = vld [vmem:[#allocation6 + $0x48] sm:$0xff]   ;;  %v1145_v28 = vld [vmem:[#allocation6 + $0x40] sm:$0xff]  }
  0x2e   :  { %1018 = vmatprep.subr.bf16.mxu1 %v1126_v9  ;;  %v1142_v25 = vld [vmem:[#allocation6 + $0xc8] sm:$0xff]   ;;  %v1146_v29 = vld [vmem:[#allocation6 + $0xc0] sm:$0xff]   ;;  %v1153_v38 = vld [vmem:[#allocation6 + $0x178] sm:$0xff]  }
  0x2f   :  { %v1143_v26 = vld [vmem:[#allocation6 + $0x8] sm:$0xff]   ;;  %v1147_v30 = vld [vmem:[#allocation6] sm:$0xff]   ;;  %v1154_v39 = vld [vmem:[#allocation6 + $0x1f8] sm:$0xff]  }
  0x30   :  { %997 = vmatpush3.bf16.msra.mxu0 %v1127_v10  ;;  %v1144_v27 = vld [vmem:[#allocation6 + $0x88] sm:$0xff]   ;;  %v1148_v31 = vld [vmem:[#allocation6 + $0x80] sm:$0xff]   ;;  %v1155_v40 = vld [vmem:[#allocation6 + $0x138] sm:$0xff]  }
  0x31   :  { %1019 = vmatpush3.bf16.msra.mxu1 %v1128_v11  ;;  %998 = vmatprep.subr.bf16.mxu0 %v1129_v12  ;;  %v61_v32 = vld [vmem:[#allocation3] sm:$0xff]  ;;  %v62_v33 = vld [vmem:[#allocation3 + $0x8] sm:$0xff]  ;;  %v1156_v41 = vld [vmem:[#allocation6 + $0x1b8] sm:$0xff]  }
  0x32   :  { %1020 = vmatprep.subr.bf16.mxu1 %v1130_v13  ;;  %v912_v34 = vcombine.low %v61_v32, %v61_v32  ;;  %v913_v35 = vcombine.high %v61_v32, %v61_v32  ;;  %v914_v36 = vcombine.low %v62_v33, %v62_v33  ;;  %v915_v37 = vcombine.high %v62_v33, %v62_v33  ;;  %v1157_v42 = vld [vmem:[#allocation6 + $0x170] sm:$0xff]   ;;  %v1161_v46 = vld [vmem:[#allocation6 + $0x168] sm:$0xff]   ;;  %v1165_v50 = vld [vmem:[#allocation6 + $0x160] sm:$0xff]  }
  0x33   :  { %v1158_v43 = vld [vmem:[#allocation6 + $0x1f0] sm:$0xff]   ;;  %v1162_v47 = vld [vmem:[#allocation6 + $0x1e8] sm:$0xff]   ;;  %v1166_v51 = vld [vmem:[#allocation6 + $0x1e0] sm:$0xff]   ;;  %v1294_v13 = vmov 0.0  }
  0x34   :  { %999 = vmatpush3.bf16.msra.mxu0 %v1131_v14  ;;  %637 = vmatprep.mubr.bf16.mxu0 %v913_v35  ;;  %v1159_v44 = vld [vmem:[#allocation6 + $0x130] sm:$0xff]   ;;  %v1163_v48 = vld [vmem:[#allocation6 + $0x128] sm:$0xff]   ;;  %v1167_v52 = vld [vmem:[#allocation6 + $0x120] sm:$0xff]  }
  0x35   :  { %1021 = vmatpush3.bf16.msra.mxu1 %v1132_v15  ;;  %1000 = vmatprep.subr.bf16.mxu0 %v1133_v16  ;;  %v1160_v45 = vld [vmem:[#allocation6 + $0x1b0] sm:$0xff]   ;;  %v1164_v49 = vld [vmem:[#allocation6 + $0x1a8] sm:$0xff]   ;;  %v1168_v53 = vld [vmem:[#allocation6 + $0x1a0] sm:$0xff]  }
  0x36   :  { %1022 = vmatprep.subr.bf16.mxu1 %v1134_v17  ;;  %677 = vmatprep.mubr.bf16.mxu1 %v915_v37  ;;  %v1169_v54 = vld [vmem:[#allocation6 + $0x158] sm:$0xff]   ;;  %v1173_v58 = vld [vmem:[#allocation6 + $0x150] sm:$0xff]   ;;  %v1177_v62 = vld [vmem:[#allocation6 + $0x148] sm:$0xff]  }
  0x37   :  { %v1170_v55 = vld [vmem:[#allocation6 + $0x1d8] sm:$0xff]   ;;  %v1174_v59 = vld [vmem:[#allocation6 + $0x1d0] sm:$0xff]   ;;  %v1178_v63 = vld [vmem:[#allocation6 + $0x1c8] sm:$0xff]  }
  0x38   :  { %1001 = vmatpush3.bf16.msra.mxu0 %v1135_v18  ;;  %v1171_v56 = vld [vmem:[#allocation6 + $0x118] sm:$0xff]   ;;  %v1175_v60 = vld [vmem:[#allocation6 + $0x110] sm:$0xff]   ;;  %v1179_v0 = vld [vmem:[#allocation6 + $0x108] sm:$0xff]  }
  0x39   :  { %1023 = vmatpush3.bf16.msra.mxu1 %v1136_v19  ;;  %1002 = vmatprep.subr.bf16.mxu0 %v1137_v20  ;;  %v1172_v57 = vld [vmem:[#allocation6 + $0x198] sm:$0xff]   ;;  %v1176_v61 = vld [vmem:[#allocation6 + $0x190] sm:$0xff]   ;;  %v1180_v1 = vld [vmem:[#allocation6 + $0x188] sm:$0xff]  }
  0x3a   :  { %1024 = vmatprep.subr.bf16.mxu1 %v1138_v21  ;;  %v1181_v2 = vld [vmem:[#allocation6 + $0x140] sm:$0xff]   ;;  %v63_v6 = vld [vmem:[#allocation3 + $0x10] sm:$0xff]  ;;  %v64_v9 = vld [vmem:[#allocation3 + $0x18] sm:$0xff] }
  0x3b   :  { %v1182_v3 = vld [vmem:[#allocation6 + $0x1c0] sm:$0xff]   ;;  %v916_v7 = vcombine.low %v63_v6, %v63_v6  ;;  %v917_v8 = vcombine.high %v63_v6, %v63_v6  ;;  %v918_v10 = vcombine.low %v64_v9, %v64_v9  ;;  %v919_v11 = vcombine.high %v64_v9, %v64_v9  ;;  %v1189_v12 = vld [vmem:[#allocation8 + $0x38] sm:$0xff]   ;;  %v1190_v14 = vld [vmem:[#allocation8 + $0x30] sm:$0xff]  }
  0x3c   :  { %1003 = vmatpush3.bf16.msra.mxu0 %v1139_v22  ;;  %v1183_v4 = vld [vmem:[#allocation6 + $0x100] sm:$0xff]   ;;  %v1191_v15 = vld [vmem:[#allocation8 + $0x28] sm:$0xff]   ;;  %v1193_v17 = vld [vmem:[#allocation8 + $0x18] sm:$0xff]  }
  0x3d   :  { %1025 = vmatpush3.bf16.msra.mxu1 %v1140_v23  ;;  %1004 = vmatprep.subr.bf16.mxu0 %v1141_v24  ;;  %v1184_v5 = vld [vmem:[#allocation6 + $0x180] sm:$0xff]   ;;  %v1194_v18 = vld [vmem:[#allocation8 + $0x10] sm:$0xff]   ;;  %v1195_v19 = vld [vmem:[#allocation8 + $0x8] sm:$0xff]  }
  0x3e   :  { %1026 = vmatprep.subr.bf16.mxu1 %v1142_v25  ;;  %v1192_v16 = vld [vmem:[#allocation8 + $0x20] sm:$0xff]  }
  0x3f   :  { %v1196_v20 = vld [vmem:[#allocation8] sm:$0xff]  }
  0x40   :  { %1005 = vmatpush3.bf16.msra.mxu0 %v1143_v26 }
  0x41   :  { %1027 = vmatpush3.bf16.msra.mxu1 %v1144_v27  ;;  %1006 = vmatprep.subr.bf16.mxu0 %v1145_v28 }
  0x42   :  { %1028 = vmatprep.subr.bf16.mxu1 %v1146_v29 }
  0x44   :  { %1007 = vmatpush3.bf16.msra.mxu0 %v1147_v30 }
  0x45   :  { %1029 = vmatpush3.bf16.msra.mxu1 %v1148_v31  ;;  %1036 = vmatprep.subr.bf16.mxu0 %v1153_v38 }
  0x46   :  { %1058 = vmatprep.subr.bf16.mxu1 %v1154_v39 }
  0x47   :  { %638 = vmatmul.mubr.bf16.vlgmr.msra.gmra.mxu0 %v912_v34 }
  0x48   :  { %678 = vmatmul.mubr.bf16.vlgmr.msra.gmra.mxu1 %v914_v36  ;;  %1037 = vmatpush3.bf16.msra.mxu0 %v1155_v40 }
  0x49   :  { %1059 = vmatpush3.bf16.msra.mxu1 %v1156_v41  ;;  %1038 = vmatprep.subr.bf16.mxu0 %v1157_v42 }
  0x4a   :  { %1060 = vmatprep.subr.bf16.mxu1 %v1158_v43  ;;  %717 = vmatprep.mubr.bf16.mxu0 %v917_v8 }
  0x4b   :  { %757 = vmatprep.mubr.bf16.mxu1 %v919_v11 }
  0x4c   :  { %1039 = vmatpush3.bf16.msra.mxu0 %v1159_v44 }
  0x4d   :  { %1061 = vmatpush3.bf16.msra.mxu1 %v1160_v45  ;;  %1040 = vmatprep.subr.bf16.mxu0 %v1161_v46 }
  0x4e   :  { %1062 = vmatprep.subr.bf16.mxu1 %v1162_v47 }
  0x50   :  { %1041 = vmatpush3.bf16.msra.mxu0 %v1163_v48  ;;  %v882_v48 = vlaneseq }
  0x51   :  { %1063 = vmatpush3.bf16.msra.mxu1 %v1164_v49  ;;  %1042 = vmatprep.subr.bf16.mxu0 %v1165_v50 }
  0x52   :  { %1064 = vmatprep.subr.bf16.mxu1 %v1166_v51  ;;  %v883_v49 = vand.u32 127, %v882_v48 }
  0x54   :  { %1043 = vmatpush3.bf16.msra.mxu0 %v1167_v52  ;;  %vm884_vm1 = vcmp.lt.s32.totalorder %v883_v49, 8 }
  0x55   :  { %1065 = vmatpush3.bf16.msra.mxu1 %v1168_v53  ;;  %1044 = vmatprep.subr.bf16.mxu0 %v1169_v54 }
  0x56   :  { %1066 = vmatprep.subr.bf16.mxu1 %v1170_v55 }
  0x58   :  { %1045 = vmatpush3.bf16.msra.mxu0 %v1171_v56 }
  0x59   :  { %1067 = vmatpush3.bf16.msra.mxu1 %v1172_v57  ;;  %1046 = vmatprep.subr.bf16.mxu0 %v1173_v58 }
  0x5a   :  { %1068 = vmatprep.subr.bf16.mxu1 %v1174_v59 }
  0x5c   :  { %1047 = vmatpush3.bf16.msra.mxu0 %v1175_v60 }
  0x5d   :  { %1069 = vmatpush3.bf16.msra.mxu1 %v1176_v61  ;;  %1048 = vmatprep.subr.bf16.mxu0 %v1177_v62 }
  0x5e   :  { %1070 = vmatprep.subr.bf16.mxu1 %v1178_v63 }
  0x60   :  { %1049 = vmatpush3.bf16.msra.mxu0 %v1179_v0 }
  0x61   :  { %1071 = vmatpush3.bf16.msra.mxu1 %v1180_v1  ;;  %1050 = vmatprep.subr.bf16.mxu0 %v1181_v2 }
  0x62   :  { %1072 = vmatprep.subr.bf16.mxu1 %v1182_v3 }
  0x64   :  { %1051 = vmatpush3.bf16.msra.mxu0 %v1183_v4 }
  0x65   :  { %1073 = vmatpush3.bf16.msra.mxu1 %v1184_v5  ;;  %1089 = vmatprep.subr.bf16.mxu0 %v1294_v13 }
  0x67   :  { %718 = vmatmul.mubr.bf16.vlgmr.msra.gmra.mxu0 %v916_v7 }
  0x68   :  { %758 = vmatmul.mubr.bf16.vlgmr.msra.gmra.mxu1 %v918_v10  ;;  %1090 = vmatpush3.bf16.msra.mxu0 %v1189_v12 }
  0x69   :  { %1091 = vmatprep.subr.bf16.mxu0 %v1294_v13  ;;  %1105 = vmatprep.mubr.msk.bf16.mxu0 %vm1295_vm0, %v1294_v13 }
  0x6c   :  { %1092 = vmatpush3.bf16.msra.mxu0 %v1190_v14 }
  0x6d   :  { %1093 = vmatprep.subr.bf16.mxu0 %v1294_v13 }
  0x70   :  { %1094 = vmatpush3.bf16.msra.mxu0 %v1191_v15 }
  0x71   :  { %1095 = vmatprep.subr.bf16.mxu0 %v1294_v13 }
  0x74   :  { %1096 = vmatpush3.bf16.msra.mxu0 %v1192_v16 }
  0x75   :  { %1097 = vmatprep.subr.bf16.mxu0 %v1294_v13 }
  0x78   :  { %1098 = vmatpush3.bf16.msra.mxu0 %v1193_v17 }
  0x79   :  { %1099 = vmatprep.subr.bf16.mxu0 %v1294_v13 }
  0x7c   :  { %1100 = vmatpush3.bf16.msra.mxu0 %v1194_v18 }
  0x7d   :  { %1101 = vmatprep.subr.bf16.mxu0 %v1294_v13 }
  0x80   :  { %1102 = vmatpush3.bf16.msra.mxu0 %v1195_v19 }
  0x81   :  { %1103 = vmatprep.subr.bf16.mxu0 %v1294_v13 }
  0x84   :  { %1104 = vmatpush3.bf16.msra.mxu0 %v1196_v20 }
 0x107   :  { %v1008_v21 = vpop.f32.mrf.mxu0 }
 0x108   :  { %v1030_v22 = vpop.f32.mrf.mxu1 }
 0x109   :  { %v1009_v23 = vpop.f32.mrf.mxu0 }
 0x10a   :  { %v1031_v24 = vpop.f32.mrf.mxu1  ;;  %v1010_v29 = vadd.f32 %v1009_v23, %v1008_v21 }
 0x10b   :  { %v1011_v25 = vpop.f32.mrf.mxu0  ;;  %v1032_v30 = vadd.f32 %v1031_v24, %v1030_v22 }
 0x10c   :  { %v1033_v26 = vpop.f32.mrf.mxu1 }
 0x10d   :  { %v1012_v27 = vpop.f32.mrf.mxu0  ;;  %v680_v35 = vadd.f32 %v1032_v30, %v1010_v29 }
 0x10e   :  { %v1034_v28 = vpop.f32.mrf.mxu1 }
 0x127   :  { %v1052_v31 = vpop.f32.mrf.mxu0 }
 0x128   :  { %v1074_v32 = vpop.f32.mrf.mxu1 }
 0x129   :  { %v1053_v33 = vpop.f32.mrf.mxu0 }
 0x12a   :  { %v1075_v34 = vpop.f32.mrf.mxu1  ;;  %v1054_v36 = vadd.f32 %v1053_v33, %v1052_v31 }
 0x12b   :  { %v1055_v37 = vpop.f32.mrf.mxu0  ;;  %v1076_v40 = vadd.f32 %v1075_v34, %v1074_v32 }
 0x12c   :  { %v1077_v38 = vpop.f32.mrf.mxu1  ;;  %v720_v39 = vadd.f32 %v1054_v36, %v680_v35 }
 0x12d   :  { %v1056_v41 = vpop.f32.mrf.mxu0 }
 0x12e   :  { %v1078_v42 = vpop.f32.mrf.mxu1  ;;  %v760_v43 = vadd.f32 %v1076_v40, %v720_v39 }
 0x130   :  { %v776_v44 = vpack.c.bf16 %v760_v43, %v760_v43  ;;  %v771_v45 = vmul.f32 %v760_v43, %v760_v43 }
 0x132   :  { %1106 = vmatmul.mubr.bf16.vlgmr.msra.gmra.mxu0 %v776_v44  ;;  %772 = vadd.xlane.f32.xlu0 %v771_v45 }
 0x1bb   :  { %v773_v46 = vpop.xlane.xlu0 %772 }
 0x1bc   :  { %v774_v47 = vadd.f32 1e-12, %v773_v46 }
 0x1be   :  { %1197 = vrsqrt.f32 %v774_v47 }
 0x1cb   :  { %v1198_v50 = vpop.eup %1197 }
 0x1f2   :  { %v875_v51 = vpop.f32.mrf.mxu0 }
 0x1f3   :  { %v881_v52 = vmul.f32 %v1198_v50, %v875_v51 }
 0x1f4   :  { %v1107_v53 = vpop.f32.mrf.mxu0 }
 0x1f5   :  { %v885_v54 = vsel %vm884_vm1, %v881_v52, -inf }
 0x1f6   :  { %v878_v55 = vpop.f32.mrf.mxu0  ;;  %886 = vmax.xlane.f32.xlu0 %v885_v54 }
 0x1f8   :  { %v1108_v56 = vpop.f32.mrf.mxu0 }
 0x27f   :  { %v887_v57 = vpop.xlane.xlu0 %886 }
 0x280   :  { %v888_v58 = vsub.f32 %v885_v54, %v887_v57 }
 0x282   :  { %v889_v59 = vmul.f32 1.442695, %v888_v58 }
 0x284   :  { %1199 = vpow2.f32 %v889_v59 }
 0x291   :  { %v1200_v60 = vpop.eup %1199 }
 0x292   :  { %891 = vadd.xlane.f32.xlu1 %v1200_v60 }
 0x31b   :  { %v892_v61 = vpop.xlane.xlu1 %891 }
 0x31c   :  { %1201 = vrcp.f32 %v892_v61 }
 0x329   :  { %v1202_v62 = vpop.eup %1201 }
 0x32a   :  { %v894_v63 = vmul.f32 %v1202_v62, %v1200_v60 }
 0x32c   :  { %895 = vst [vmem:[#allocation9] sm:$0xff] %v894_v63 }
 0x32d   :  { %1274 = shalt.err (!%p1271_p5)
}
 0x32e   :  { %905 = dma.vmem_to_hbm [thread:$0]  %s903_s2, 128, %s1332_s3, [#allocation5]  }
 0x32f   :  { %1287 = dma.done.wait [#allocation5], 128  }
 0x330   :  { %1288 = vsyncadd [#allocation5], 4294967168 }
 0x331   :  { %909 = vsyncpa [#allocation4], 1 }
 0x332   :  { %910 = vsyncpa [#allocation7], 1 }
 0x333   :  { %911 = vsyncpa [#allocation5], 1 }

// kernel: tpu_custom_call.1
= control target key start
LH: loop header
LB: loop body
LE: loop exit
PB: predicated region body
PF: predicated region fallthrough
CT: control target
= control target key end

     0   :  { %8 = vsyncpa [#allocation4], 0  ;;  %s1329_s0 = inlined_call_operand.hbm [shape: bf16[8,1024], index: 0, kind: input, shape index: {}]   ;;  %s1330_s1 = inlined_call_operand.hbm [shape: bf16[1024,128], index: 1, kind: input, shape index: {}]   ;;  %s1331_s2 = inlined_call_operand.hbm [shape: bf16[128,128], index: 2, kind: input, shape index: {}]   ;;  %s1332_s3 = inlined_call_operand.hbm [shape: f32[8,128], index: 3, kind: output, shape index: {}]  }
   0x1   :  { %9 = vsyncpa [#allocation7], 0 }
   0x2   :  { %10 = vsyncpa [#allocation5], 0  ;;  %s1289_s12 = smov [#allocation6]  }
   0x3   :  { %s26_s13 = sshll.u32 %s1289_s12, 4  ;;  %s27_s13 = int_to_ptr.vmem [resolvable:$true] %s26_s13 }
   0x4   :  { %s1211_s14 = scalar_lea.vmem %s27_s13, 8192  ;;  %p1216_p1 = scmp.lt.s32.totalorder %s27_s13, %s27_s13 }
   0x5   :  { %p1212_p0 = scmp.ne.s32.totalorder %s27_s13, %s1211_s14  ;;  %p1217_p2 = scmp.lt.s32.totalorder %s1211_s14, %s1211_s14 }
   0x7   :  { %p1218_p3 = por %p1217_p2, %p1216_p1 }
   0x9   :  { %p1219_p4 = pnand %p1218_p3, %p1212_p0 }
   0xb   :  { %1222 = shalt.err (!%p1219_p4)
}
   0xc   :  { %s1290_s15 = smov 64   ;;  %s1291_s16 = smov 4  }
   0xd   :  { %32 = dma.hbm_to_vmem [thread:$0]  %s1330_s1, 8192, %s27_s13, [#allocation7], %s1290_s15, %s1290_s15, %s1291_s16  }
   0xe   :  { %s1292_s19 = smov [#allocation3]   ;;  %s1293_s21 = smov [#allocation8]  }
   0xf   :  { %s17_s20 = sshll.u32 %s1292_s19, 4  ;;  %s38_s22 = sshll.u32 %s1293_s21, 4  ;;  %s18_s20 = int_to_ptr.vmem [resolvable:$true] %s17_s20  ;;  %s39_s22 = int_to_ptr.vmem [resolvable:$true] %s38_s22 }
  0x10   :  { %s1231_s23 = scalar_lea.vmem %s18_s20, 512  ;;  %p1236_p6 = scmp.lt.s32.totalorder %s18_s20, %s18_s20 }
  0x11   :  { %p1232_p5 = scmp.ne.s32.totalorder %s18_s20, %s1231_s23  ;;  %p1237_p7 = scmp.lt.s32.totalorder %s1231_s23, %s1231_s23 }
  0x13   :  { %p1238_p8 = por %p1237_p7, %p1236_p6 }
  0x15   :  { %p1239_p9 = pnand %p1238_p8, %p1232_p5 }
  0x17   :  { %1242 = shalt.err (!%p1239_p9)
}
  0x18   :  { %20 = dma.hbm_to_vmem [thread:$0]  %s1329_s0, 512, %s18_s20, [#allocation4]  }
  0x19   :  { %s1251_s26 = scalar_lea.vmem %s39_s22, 1024  ;;  %p1256_p11 = scmp.lt.s32.totalorder %s39_s22, %s39_s22 }
  0x1a   :  { %p1252_p10 = scmp.ne.s32.totalorder %s39_s22, %s1251_s26  ;;  %p1257_p12 = scmp.lt.s32.totalorder %s1251_s26, %s1251_s26 }
  0x1c   :  { %p1258_p13 = por %p1257_p12, %p1256_p11 }
  0x1e   :  { %p1259_p0 = pnand %p1258_p13, %p1252_p10 }
  0x20   :  { %1262 = shalt.err (!%p1259_p0)
}
  0x21   :  { %44 = dma.hbm_to_vmem [thread:$0]  %s1331_s2, 1024, %s39_s22, [#allocation7], %s1290_s15, %s1290_s15, %s1291_s16  }
  0x22   :  { %1283 = dma.done.wait [#allocation4], 512  }
  0x23   :  { %1284 = vsyncadd [#allocation4], 4294966784 }
  0x24   :  { %1285 = dma.done.wait [#allocation7], 9216  }
  0x25   :  { %1286 = vsyncadd [#allocation7], 4294958080  ;;  %v1117_v0 = vld [vmem:[#allocation6 + $0x78] sm:$0xff]   ;;  %v1121_v4 = vld [vmem:[#allocation6 + $0x70] sm:$0xff]   ;;  %vm1295_vm0 = vmmov 0   ;;  %s1296_s0 = smov [#allocation9]  }
  0x26   :  { %v1118_v1 = vld [vmem:[#allocation6 + $0xf8] sm:$0xff]   ;;  %992 = vmatprep.subr.bf16.mxu0 %v1117_v0  ;;  %v1122_v5 = vld [vmem:[#allocation6 + $0xf0] sm:$0xff]   ;;  %v1125_v8 = vld [vmem:[#allocation6 + $0x68] sm:$0xff]   ;;  %s902_s2 = sshll.u32 %s1296_s0, 4  ;;  %s903_s2 = int_to_ptr.vmem [resolvable:$true] %s902_s2 }
  0x27   :  { %v1119_v2 = vld [vmem:[#allocation6 + $0x38] sm:$0xff]   ;;  %1014 = vmatprep.subr.bf16.mxu1 %v1118_v1  ;;  %v1123_v6 = vld [vmem:[#allocation6 + $0x30] sm:$0xff]   ;;  %v1126_v9 = vld [vmem:[#allocation6 + $0xe8] sm:$0xff]   ;;  %s1263_s28 = scalar_lea.vmem %s903_s2, 128  ;;  %p1268_p2 = scmp.lt.s32.totalorder %s903_s2, %s903_s2 }
  0x28   :  { %v1120_v3 = vld [vmem:[#allocation6 + $0xb8] sm:$0xff]   ;;  %993 = vmatpush3.bf16.msra.mxu0 %v1119_v2  ;;  %v1124_v7 = vld [vmem:[#allocation6 + $0xb0] sm:$0xff]   ;;  %v1127_v10 = vld [vmem:[#allocation6 + $0x28] sm:$0xff]   ;;  %p1264_p1 = scmp.ne.s32.totalorder %s903_s2, %s1263_s28  ;;  %p1269_p3 = scmp.lt.s32.totalorder %s1263_s28, %s1263_s28 }
  0x29   :  { %1015 = vmatpush3.bf16.msra.mxu1 %v1120_v3  ;;  %994 = vmatprep.subr.bf16.mxu0 %v1121_v4  ;;  %v1128_v11 = vld [vmem:[#allocation6 + $0xa8] sm:$0xff]   ;;  %v1129_v12 = vld [vmem:[#allocation6 + $0x60] sm:$0xff]   ;;  %v1133_v16 = vld [vmem:[#allocation6 + $0x58] sm:$0xff]  }
  0x2a   :  { %1016 = vmatprep.subr.bf16.mxu1 %v1122_v5  ;;  %v1130_v13 = vld [vmem:[#allocation6 + $0xe0] sm:$0xff]   ;;  %v1134_v17 = vld [vmem:[#allocation6 + $0xd8] sm:$0xff]   ;;  %v1137_v20 = vld [vmem:[#allocation6 + $0x50] sm:$0xff]   ;;  %p1270_p4 = por %p1269_p3, %p1268_p2 }
  0x2b   :  { %v1131_v14 = vld [vmem:[#allocation6 + $0x20] sm:$0xff]   ;;  %v1135_v18 = vld [vmem:[#allocation6 + $0x18] sm:$0xff]   ;;  %v1138_v21 = vld [vmem:[#allocation6 + $0xd0] sm:$0xff]  }
  0x2c   :  { %995 = vmatpush3.bf16.msra.mxu0 %v1123_v6  ;;  %v1132_v15 = vld [vmem:[#allocation6 + $0xa0] sm:$0xff]   ;;  %v1136_v19 = vld [vmem:[#allocation6 + $0x98] sm:$0xff]   ;;  %v1139_v22 = vld [vmem:[#allocation6 + $0x10] sm:$0xff]   ;;  %p1271_p5 = pnand %p1270_p4, %p1264_p1 }
  0x2d   :  { %1017 = vmatpush3.bf16.msra.mxu1 %v1124_v7  ;;  %996 = vmatprep.subr.bf16.mxu0 %v1125_v8  ;;  %v1140_v23 = vld [vmem:[#allocation6 + $0x90] sm:$0xff]   ;;  %v1141_v24 = vld [vmem:[#allocation6 + $0x48] sm:$0xff]   ;;  %v1145_v28 = vld [vmem:[#allocation6 + $0x40] sm:$0xff]  }
  0x2e   :  { %1018 = vmatprep.subr.bf16.mxu1 %v1126_v9  ;;  %v1142_v25 = vld [vmem:[#allocation6 + $0xc8] sm:$0xff]   ;;  %v1146_v29 = vld [vmem:[#allocation6 + $0xc0] sm:$0xff]   ;;  %v1153_v38 = vld [vmem:[#allocation6 + $0x178] sm:$0xff]  }
  0x2f   :  { %v1143_v26 = vld [vmem:[#allocation6 + $0x8] sm:$0xff]   ;;  %v1147_v30 = vld [vmem:[#allocation6] sm:$0xff]   ;;  %v1154_v39 = vld [vmem:[#allocation6 + $0x1f8] sm:$0xff]  }
  0x30   :  { %997 = vmatpush3.bf16.msra.mxu0 %v1127_v10  ;;  %v1144_v27 = vld [vmem:[#allocation6 + $0x88] sm:$0xff]   ;;  %v1148_v31 = vld [vmem:[#allocation6 + $0x80] sm:$0xff]   ;;  %v1155_v40 = vld [vmem:[#allocation6 + $0x138] sm:$0xff]  }
  0x31   :  { %1019 = vmatpush3.bf16.msra.mxu1 %v1128_v11  ;;  %998 = vmatprep.subr.bf16.mxu0 %v1129_v12  ;;  %v61_v32 = vld [vmem:[#allocation3] sm:$0xff]  ;;  %v62_v33 = vld [vmem:[#allocation3 + $0x8] sm:$0xff]  ;;  %v1156_v41 = vld [vmem:[#allocation6 + $0x1b8] sm:$0xff]  }
  0x32   :  { %1020 = vmatprep.subr.bf16.mxu1 %v1130_v13  ;;  %v912_v34 = vcombine.low %v61_v32, %v61_v32  ;;  %v913_v35 = vcombine.high %v61_v32, %v61_v32  ;;  %v914_v36 = vcombine.low %v62_v33, %v62_v33  ;;  %v915_v37 = vcombine.high %v62_v33, %v62_v33  ;;  %v1157_v42 = vld [vmem:[#allocation6 + $0x170] sm:$0xff]   ;;  %v1161_v46 = vld [vmem:[#allocation6 + $0x168] sm:$0xff]   ;;  %v1165_v50 = vld [vmem:[#allocation6 + $0x160] sm:$0xff]  }
  0x33   :  { %v1158_v43 = vld [vmem:[#allocation6 + $0x1f0] sm:$0xff]   ;;  %v1162_v47 = vld [vmem:[#allocation6 + $0x1e8] sm:$0xff]   ;;  %v1166_v51 = vld [vmem:[#allocation6 + $0x1e0] sm:$0xff]   ;;  %v1294_v13 = vmov 0.0  }
  0x34   :  { %999 = vmatpush3.bf16.msra.mxu0 %v1131_v14  ;;  %637 = vmatprep.mubr.bf16.mxu0 %v913_v35  ;;  %v1159_v44 = vld [vmem:[#allocation6 + $0x130] sm:$0xff]   ;;  %v1163_v48 = vld [vmem:[#allocation6 + $0x128] sm:$0xff]   ;;  %v1167_v52 = vld [vmem:[#allocation6 + $0x120] sm:$0xff]  }
  0x35   :  { %1021 = vmatpush3.bf16.msra.mxu1 %v1132_v15  ;;  %1000 = vmatprep.subr.bf16.mxu0 %v1133_v16  ;;  %v1160_v45 = vld [vmem:[#allocation6 + $0x1b0] sm:$0xff]   ;;  %v1164_v49 = vld [vmem:[#allocation6 + $0x1a8] sm:$0xff]   ;;  %v1168_v53 = vld [vmem:[#allocation6 + $0x1a0] sm:$0xff]  }
  0x36   :  { %1022 = vmatprep.subr.bf16.mxu1 %v1134_v17  ;;  %677 = vmatprep.mubr.bf16.mxu1 %v915_v37  ;;  %v1169_v54 = vld [vmem:[#allocation6 + $0x158] sm:$0xff]   ;;  %v1173_v58 = vld [vmem:[#allocation6 + $0x150] sm:$0xff]   ;;  %v1177_v62 = vld [vmem:[#allocation6 + $0x148] sm:$0xff]  }
  0x37   :  { %v1170_v55 = vld [vmem:[#allocation6 + $0x1d8] sm:$0xff]   ;;  %v1174_v59 = vld [vmem:[#allocation6 + $0x1d0] sm:$0xff]   ;;  %v1178_v63 = vld [vmem:[#allocation6 + $0x1c8] sm:$0xff]  }
  0x38   :  { %1001 = vmatpush3.bf16.msra.mxu0 %v1135_v18  ;;  %v1171_v56 = vld [vmem:[#allocation6 + $0x118] sm:$0xff]   ;;  %v1175_v60 = vld [vmem:[#allocation6 + $0x110] sm:$0xff]   ;;  %v1179_v0 = vld [vmem:[#allocation6 + $0x108] sm:$0xff]  }
  0x39   :  { %1023 = vmatpush3.bf16.msra.mxu1 %v1136_v19  ;;  %1002 = vmatprep.subr.bf16.mxu0 %v1137_v20  ;;  %v1172_v57 = vld [vmem:[#allocation6 + $0x198] sm:$0xff]   ;;  %v1176_v61 = vld [vmem:[#allocation6 + $0x190] sm:$0xff]   ;;  %v1180_v1 = vld [vmem:[#allocation6 + $0x188] sm:$0xff]  }
  0x3a   :  { %1024 = vmatprep.subr.bf16.mxu1 %v1138_v21  ;;  %v1181_v2 = vld [vmem:[#allocation6 + $0x140] sm:$0xff]   ;;  %v63_v6 = vld [vmem:[#allocation3 + $0x10] sm:$0xff]  ;;  %v64_v9 = vld [vmem:[#allocation3 + $0x18] sm:$0xff] }
  0x3b   :  { %v1182_v3 = vld [vmem:[#allocation6 + $0x1c0] sm:$0xff]   ;;  %v916_v7 = vcombine.low %v63_v6, %v63_v6  ;;  %v917_v8 = vcombine.high %v63_v6, %v63_v6  ;;  %v918_v10 = vcombine.low %v64_v9, %v64_v9  ;;  %v919_v11 = vcombine.high %v64_v9, %v64_v9  ;;  %v1189_v12 = vld [vmem:[#allocation8 + $0x38] sm:$0xff]   ;;  %v1190_v14 = vld [vmem:[#allocation8 + $0x30] sm:$0xff]  }
  0x3c   :  { %1003 = vmatpush3.bf16.msra.mxu0 %v1139_v22  ;;  %v1183_v4 = vld [vmem:[#allocation6 + $0x100] sm:$0xff]   ;;  %v1191_v15 = vld [vmem:[#allocation8 + $0x28] sm:$0xff]   ;;  %v1193_v17 = vld [vmem:[#allocation8 + $0x18] sm:$0xff]  }
  0x3d   :  { %1025 = vmatpush3.bf16.msra.mxu1 %v1140_v23  ;;  %1004 = vmatprep.subr.bf16.mxu0 %v1141_v24  ;;  %v1184_v5 = vld [vmem:[#allocation6 + $0x180] sm:$0xff]   ;;  %v1194_v18 = vld [vmem:[#allocation8 + $0x10] sm:$0xff]   ;;  %v1195_v19 = vld [vmem:[#allocation8 + $0x8] sm:$0xff]  }
  0x3e   :  { %1026 = vmatprep.subr.bf16.mxu1 %v1142_v25  ;;  %v1192_v16 = vld [vmem:[#allocation8 + $0x20] sm:$0xff]  }
  0x3f   :  { %v1196_v20 = vld [vmem:[#allocation8] sm:$0xff]  }
  0x40   :  { %1005 = vmatpush3.bf16.msra.mxu0 %v1143_v26 }
  0x41   :  { %1027 = vmatpush3.bf16.msra.mxu1 %v1144_v27  ;;  %1006 = vmatprep.subr.bf16.mxu0 %v1145_v28 }
  0x42   :  { %1028 = vmatprep.subr.bf16.mxu1 %v1146_v29 }
  0x44   :  { %1007 = vmatpush3.bf16.msra.mxu0 %v1147_v30 }
  0x45   :  { %1029 = vmatpush3.bf16.msra.mxu1 %v1148_v31  ;;  %1036 = vmatprep.subr.bf16.mxu0 %v1153_v38 }
  0x46   :  { %1058 = vmatprep.subr.bf16.mxu1 %v1154_v39 }
  0x47   :  { %638 = vmatmul.mubr.bf16.vlgmr.msra.gmra.mxu0 %v912_v34 }
  0x48   :  { %678 = vmatmul.mubr.bf16.vlgmr.msra.gmra.mxu1 %v914_v36  ;;  %1037 = vmatpush3.bf16.msra.mxu0 %v1155_v40 }
  0x49   :  { %1059 = vmatpush3.bf16.msra.mxu1 %v1156_v41  ;;  %1038 = vmatprep.subr.bf16.mxu0 %v1157_v42 }
  0x4a   :  { %1060 = vmatprep.subr.bf16.mxu1 %v1158_v43  ;;  %717 = vmatprep.mubr.bf16.mxu0 %v917_v8 }
  0x4b   :  { %757 = vmatprep.mubr.bf16.mxu1 %v919_v11 }
  0x4c   :  { %1039 = vmatpush3.bf16.msra.mxu0 %v1159_v44 }
  0x4d   :  { %1061 = vmatpush3.bf16.msra.mxu1 %v1160_v45  ;;  %1040 = vmatprep.subr.bf16.mxu0 %v1161_v46 }
  0x4e   :  { %1062 = vmatprep.subr.bf16.mxu1 %v1162_v47 }
  0x50   :  { %1041 = vmatpush3.bf16.msra.mxu0 %v1163_v48  ;;  %v882_v48 = vlaneseq }
  0x51   :  { %1063 = vmatpush3.bf16.msra.mxu1 %v1164_v49  ;;  %1042 = vmatprep.subr.bf16.mxu0 %v1165_v50 }
  0x52   :  { %1064 = vmatprep.subr.bf16.mxu1 %v1166_v51  ;;  %v883_v49 = vand.u32 127, %v882_v48 }
  0x54   :  { %1043 = vmatpush3.bf16.msra.mxu0 %v1167_v52  ;;  %vm884_vm1 = vcmp.lt.s32.totalorder %v883_v49, 8 }
  0x55   :  { %1065 = vmatpush3.bf16.msra.mxu1 %v1168_v53  ;;  %1044 = vmatprep.subr.bf16.mxu0 %v1169_v54 }
  0x56   :  { %1066 = vmatprep.subr.bf16.mxu1 %v1170_v55 }
  0x58   :  { %1045 = vmatpush3.bf16.msra.mxu0 %v1171_v56 }
  0x59   :  { %1067 = vmatpush3.bf16.msra.mxu1 %v1172_v57  ;;  %1046 = vmatprep.subr.bf16.mxu0 %v1173_v58 }
  0x5a   :  { %1068 = vmatprep.subr.bf16.mxu1 %v1174_v59 }
  0x5c   :  { %1047 = vmatpush3.bf16.msra.mxu0 %v1175_v60 }
  0x5d   :  { %1069 = vmatpush3.bf16.msra.mxu1 %v1176_v61  ;;  %1048 = vmatprep.subr.bf16.mxu0 %v1177_v62 }
  0x5e   :  { %1070 = vmatprep.subr.bf16.mxu1 %v1178_v63 }
  0x60   :  { %1049 = vmatpush3.bf16.msra.mxu0 %v1179_v0 }
  0x61   :  { %1071 = vmatpush3.bf16.msra.mxu1 %v1180_v1  ;;  %1050 = vmatprep.subr.bf16.mxu0 %v1181_v2 }
  0x62   :  { %1072 = vmatprep.subr.bf16.mxu1 %v1182_v3 }
  0x64   :  { %1051 = vmatpush3.bf16.msra.mxu0 %v1183_v4 }
  0x65   :  { %1073 = vmatpush3.bf16.msra.mxu1 %v1184_v5  ;;  %1089 = vmatprep.subr.bf16.mxu0 %v1294_v13 }
  0x67   :  { %718 = vmatmul.mubr.bf16.vlgmr.msra.gmra.mxu0 %v916_v7 }
  0x68   :  { %758 = vmatmul.mubr.bf16.vlgmr.msra.gmra.mxu1 %v918_v10  ;;  %1090 = vmatpush3.bf16.msra.mxu0 %v1189_v12 }
  0x69   :  { %1091 = vmatprep.subr.bf16.mxu0 %v1294_v13  ;;  %1105 = vmatprep.mubr.msk.bf16.mxu0 %vm1295_vm0, %v1294_v13 }
  0x6c   :  { %1092 = vmatpush3.bf16.msra.mxu0 %v1190_v14 }
  0x6d   :  { %1093 = vmatprep.subr.bf16.mxu0 %v1294_v13 }
  0x70   :  { %1094 = vmatpush3.bf16.msra.mxu0 %v1191_v15 }
  0x71   :  { %1095 = vmatprep.subr.bf16.mxu0 %v1294_v13 }
  0x74   :  { %1096 = vmatpush3.bf16.msra.mxu0 %v1192_v16 }
  0x75   :  { %1097 = vmatprep.subr.bf16.mxu0 %v1294_v13 }
  0x78   :  { %1098 = vmatpush3.bf16.msra.mxu0 %v1193_v17 }
  0x79   :  { %1099 = vmatprep.subr.bf16.mxu0 %v1294_v13 }
  0x7c   :  { %1100 = vmatpush3.bf16.msra.mxu0 %v1194_v18 }
  0x7d   :  { %1101 = vmatprep.subr.bf16.mxu0 %v1294_v13 }
  0x80   :  { %1102 = vmatpush3.bf16.msra.mxu0 %v1195_v19 }
  0x81   :  { %1103 = vmatprep.subr.bf16.mxu0 %v1294_v13 }
  0x84   :  { %1104 = vmatpush3.bf16.msra.mxu0 %v1196_v20 }
 0x107   :  { %v1008_v21 = vpop.f32.mrf.mxu0 }
 0x108   :  { %v1030_v22 = vpop.f32.mrf.mxu1 }
 0x109   :  { %v1009_v23 = vpop.f32.mrf.mxu0 }
 0x10a   :  { %v1031_v24 = vpop.f32.mrf.mxu1  ;;  %v1010_v29 = vadd.f32 %v1009_v23, %v1008_v21 }
 0x10b   :  { %v1011_v25 = vpop.f32.mrf.mxu0  ;;  %v1032_v30 = vadd.f32 %v1031_v24, %v1030_v22 }
 0x10c   :  { %v1033_v26 = vpop.f32.mrf.mxu1 }
 0x10d   :  { %v1012_v27 = vpop.f32.mrf.mxu0  ;;  %v680_v35 = vadd.f32 %v1032_v30, %v1010_v29 }
 0x10e   :  { %v1034_v28 = vpop.f32.mrf.mxu1 }
 0x127   :  { %v1052_v31 = vpop.f32.mrf.mxu0 }
 0x128   :  { %v1074_v32 = vpop.f32.mrf.mxu1 }
 0x129   :  { %v1053_v33 = vpop.f32.mrf.mxu0 }
 0x12a   :  { %v1075_v34 = vpop.f32.mrf.mxu1  ;;  %v1054_v36 = vadd.f32 %v1053_v33, %v1052_v31 }
 0x12b   :  { %v1055_v37 = vpop.f32.mrf.mxu0  ;;  %v1076_v40 = vadd.f32 %v1075_v34, %v1074_v32 }
 0x12c   :  { %v1077_v38 = vpop.f32.mrf.mxu1  ;;  %v720_v39 = vadd.f32 %v1054_v36, %v680_v35 }
 0x12d   :  { %v1056_v41 = vpop.f32.mrf.mxu0 }
 0x12e   :  { %v1078_v42 = vpop.f32.mrf.mxu1  ;;  %v760_v43 = vadd.f32 %v1076_v40, %v720_v39 }
 0x130   :  { %v776_v44 = vpack.c.bf16 %v760_v43, %v760_v43  ;;  %v771_v45 = vmul.f32 %v760_v43, %v760_v43 }
 0x132   :  { %1106 = vmatmul.mubr.bf16.vlgmr.msra.gmra.mxu0 %v776_v44  ;;  %772 = vadd.xlane.f32.xlu0 %v771_v45 }
 0x1bb   :  { %v773_v46 = vpop.xlane.xlu0 %772 }
 0x1bc   :  { %v774_v47 = vadd.f32 1e-12, %v773_v46 }
 0x1be   :  { %1197 = vrsqrt.f32 %v774_v47 }
 0x1cb   :  { %v1198_v50 = vpop.eup %1197 }
 0x1f2   :  { %v875_v51 = vpop.f32.mrf.mxu0 }
 0x1f3   :  { %v881_v52 = vmul.f32 %v1198_v50, %v875_v51 }
 0x1f4   :  { %v1107_v53 = vpop.f32.mrf.mxu0 }
 0x1f5   :  { %v885_v54 = vsel %vm884_vm1, %v881_v52, -inf }
 0x1f6   :  { %v878_v55 = vpop.f32.mrf.mxu0  ;;  %886 = vmax.xlane.f32.xlu0 %v885_v54 }
 0x1f8   :  { %v1108_v56 = vpop.f32.mrf.mxu0 }
 0x27f   :  { %v887_v57 = vpop.xlane.xlu0 %886 }
 0x280   :  { %v888_v58 = vsub.f32 %v885_v54, %v887_v57 }
 0x282   :  { %v889_v59 = vmul.f32 1.442695, %v888_v58 }
 0x284   :  { %1199 = vpow2.f32 %v889_v59 }
 0x291   :  { %v1200_v60 = vpop.eup %1199 }
 0x292   :  { %891 = vadd.xlane.f32.xlu1 %v1200_v60 }
 0x31b   :  { %v892_v61 = vpop.xlane.xlu1 %891 }
 0x31c   :  { %1201 = vrcp.f32 %v892_v61 }
 0x329   :  { %v1202_v62 = vpop.eup %1201 }
 0x32a   :  { %v894_v63 = vmul.f32 %v1202_v62, %v1200_v60 }
 0x32c   :  { %895 = vst [vmem:[#allocation9] sm:$0xff] %v894_v63 }
 0x32d   :  { %1274 = shalt.err (!%p1271_p5)
}
 0x32e   :  { %905 = dma.vmem_to_hbm [thread:$0]  %s903_s2, 128, %s1332_s3, [#allocation5]  }
 0x32f   :  { %1287 = dma.done.wait [#allocation5], 128  }
 0x330   :  { %1288 = vsyncadd [#allocation5], 4294967168 }
 0x331   :  { %909 = vsyncpa [#allocation4], 1 }
 0x332   :  { %910 = vsyncpa [#allocation7], 1 }
 0x333   :  { %911 = vsyncpa [#allocation5], 1 }

</bundles_post_ra>
